<compile_context>
chip_gen: v7x
topology: tpu7x:2x2x1
jax: 0.10.0
libtpu: 0.0.40
codegen_flags: <defaults>
</compile_context>

<pallas_src>
import functools

import jax
import jax.numpy as jnp
from jax.experimental import pallas as pl
from jax.experimental.pallas import tpu as pltpu


def _fused_prompt_kernel(*refs, n_keys, n_ctx):
    """refs = [ctx, prefix_0..prefix_{K-1}, suffix_0..suffix_{K-1}, out_0..out_{K-1}].

    ctx_ref   : (n_ctx, dim)           -- shared learnable context
    prefix_k  : (n_cls_k, 1,     dim)
    suffix_k  : (n_cls_k, n_sfx, dim)
    out_k     : (n_cls_k, seq,   dim)  -- seq = 1 + n_ctx + n_sfx
    """
    ctx_ref = refs[0]
    prefix_refs = refs[1:1 + n_keys]
    suffix_refs = refs[1 + n_keys:1 + 2 * n_keys]
    out_refs = refs[1 + 2 * n_keys:]

    ctx = ctx_ref[...]                                 # (n_ctx, dim)
    dim = ctx.shape[-1]

    for p_ref, s_ref, o_ref in zip(prefix_refs, suffix_refs, out_refs):
        n_cls = o_ref.shape[0]
        # [prefix | broadcast(ctx) | suffix] via three straight slice stores
        # (no concatenate -> no sublane-shuffle / temporary).
        o_ref[:, 0:1, :] = p_ref[...]
        o_ref[:, 1:1 + n_ctx, :] = jnp.broadcast_to(
            ctx[None, :, :], (n_cls, n_ctx, dim))
        o_ref[:, 1 + n_ctx:, :] = s_ref[...]


def build_prompts_fused(ctx, token_prefix, token_suffix, keys):
    """One pallas_call producing the prompts for every dict key.

    ctx          : (n_ctx, dim)           -- learnable context (nn.Parameter)
    token_prefix : {key: (n_cls, 1, dim)}
    token_suffix : {key: (n_cls, n_sfx, dim)}
    returns      : {key: (n_cls, 1 + n_ctx + n_sfx, dim)}
    """
    keys = list(keys)
    n_ctx, dim = ctx.shape
    dtype = ctx.dtype

    in_arrays = [ctx]
    in_specs = [pl.BlockSpec((n_ctx, dim), lambda i: (0, 0))]
    out_shapes = []
    out_specs = []

    for k in keys:
        pre = token_prefix[k]
        n_cls, one, _ = pre.shape
        assert one == 1
        in_arrays.append(pre)
        in_specs.append(pl.BlockSpec((n_cls, 1, dim), lambda i: (0, 0, 0)))

    for k in keys:
        suf = token_suffix[k]
        n_cls, n_sfx, _ = suf.shape
        in_arrays.append(suf)
        in_specs.append(pl.BlockSpec((n_cls, n_sfx, dim), lambda i: (0, 0, 0)))

    for k in keys:
        n_cls = token_prefix[k].shape[0]
        n_sfx = token_suffix[k].shape[1]
        seq = 1 + n_ctx + n_sfx
        out_shapes.append(jax.ShapeDtypeStruct((n_cls, seq, dim), dtype))
        out_specs.append(pl.BlockSpec((n_cls, seq, dim), lambda i: (0, 0, 0)))

    kernel = functools.partial(_fused_prompt_kernel,
                               n_keys=len(keys), n_ctx=n_ctx)

    outs = pl.pallas_call(
        kernel,
        out_shape=tuple(out_shapes),
        grid=(1,),                       # single step; whole problem fits VMEM
        in_specs=in_specs,
        out_specs=tuple(out_specs),
        compiler_params=pltpu.CompilerParams(
            dimension_semantics=("arbitrary",),   # keep on one core
        ),
    )(*in_arrays)

    return {k: o for k, o in zip(keys, outs)}


class PromptLearnerPallas:
    """JAX/Pallas re-implementation of PromptLearner.forward().

    Parameters (ctx, token_prefix, token_suffix) are initialized
    deterministically in-script instead of via CLIP's token embedding.
    """

    def __init__(self, classnames_dict, *, embed_dim=128, n_ctx=4, seq_len=16,
                 dtype=jnp.float32, seed=0):
        # Mirror __init__ preprocessing: strip "a photo of a ", force obj = ['person'].
        classnames_dict = {
            k: [name.replace("a photo of a ", "") for name in v]
            for k, v in classnames_dict.items()
        }
        classnames_dict["obj"] = ["person"]
        self.classnames_dict = classnames_dict
        self.keys = list(classnames_dict.keys())

        n_sfx = seq_len - 1 - n_ctx
        assert n_sfx > 0

        key = jax.random.PRNGKey(seed)
        key, k_ctx = jax.random.split(key)
        # nn.Parameter(ctx_vectors): shared learnable context, shape (n_ctx, dim)
        self.ctx = (jax.random.normal(k_ctx, (n_ctx, embed_dim)) * 0.02).astype(dtype)

        # token_prefix / token_suffix stand in for the frozen CLIP token embeddings.
        self.token_prefix = {}
        self.token_suffix = {}
        for name in sorted(classnames_dict.keys()):
            n_cls = len(classnames_dict[name])
            key, k_pre, k_suf = jax.random.split(key, 3)
            self.token_prefix[name] = (
                jax.random.normal(k_pre, (n_cls, 1, embed_dim)) * 0.02
            ).astype(dtype)
            self.token_suffix[name] = (
                jax.random.normal(k_suf, (n_cls, n_sfx, embed_dim)) * 0.02
            ).astype(dtype)

    def forward(self):
        # Single fused kernel launch for every dict key.
        return build_prompts_fused(
            self.ctx, self.token_prefix, self.token_suffix, self.keys
        )


def _reference_forward(learner):
    """Pure-JAX reference (torch.cat / expand semantics)."""
    out = {}
    for k in learner.classnames_dict.keys():
        n_cls = learner.token_prefix[k].shape[0]
        ctx = jnp.broadcast_to(learner.ctx[None], (n_cls,) + learner.ctx.shape)
        out[k] = jnp.concatenate(
            [learner.token_prefix[k], ctx, learner.token_suffix[k]], axis=1
        )
    return out


if __name__ == "__main__":
    classnames_dict = {
        "verb": ["ride a bike", "hold a cup", "kick a ball",
                 "pet a dog", "open a door", "throw a frisbee"],
        "obj": ["person"],
    }

    learner = PromptLearnerPallas(
        classnames_dict, embed_dim=128, n_ctx=4, seq_len=16, seed=0
    )

    prompts = learner.forward()
    for k in prompts:
        prompts[k] = jax.block_until_ready(prompts[k])

    ref = _reference_forward(learner)
    for k in prompts:
        assert prompts[k].shape == ref[k].shape, (k, prompts[k].shape, ref[k].shape)
        assert jnp.allclose(prompts[k], ref[k]), f"mismatch for key {k}"

    print("KERNEL_OK")
</pallas_src>

<mosaic_0001>
module attributes {stable_mosaic.version = 11 : i64} {
  func.func @_fused_prompt_kernel(%arg0: i32, %arg1: memref<4x128xf32, #tpu.memory_space<vmem>>, %arg2: memref<6x1x128xf32, #tpu.memory_space<vmem>>, %arg3: memref<1x1x128xf32, #tpu.memory_space<vmem>>, %arg4: memref<6x11x128xf32, #tpu.memory_space<vmem>>, %arg5: memref<1x11x128xf32, #tpu.memory_space<vmem>>, %arg6: memref<6x16x128xf32, #tpu.memory_space<vmem>>, %arg7: memref<1x16x128xf32, #tpu.memory_space<vmem>>) attributes {dimension_semantics = [#tpu.dimension_semantics<arbitrary>], iteration_bounds = array<i64: 1>, scalar_prefetch = 0 : i64, scratch_operands = 0 : i64, tpu.core_type = #tpu.core_type<tc>, window_params = [{pipeline_mode = #tpu.pipeline_mode<synchronous>, transform_indices = @transform_0, window_bounds = array<i64: 4, 128>}, {pipeline_mode = #tpu.pipeline_mode<synchronous>, transform_indices = @transform_1, window_bounds = array<i64: 6, 1, 128>}, {pipeline_mode = #tpu.pipeline_mode<synchronous>, transform_indices = @transform_2, window_bounds = array<i64: 1, 1, 128>}, {pipeline_mode = #tpu.pipeline_mode<synchronous>, transform_indices = @transform_3, window_bounds = array<i64: 6, 11, 128>}, {pipeline_mode = #tpu.pipeline_mode<synchronous>, transform_indices = @transform_4, window_bounds = array<i64: 1, 11, 128>}, {pipeline_mode = #tpu.pipeline_mode<synchronous>, transform_indices = @transform_5, window_bounds = array<i64: 6, 16, 128>}, {pipeline_mode = #tpu.pipeline_mode<synchronous>, transform_indices = @transform_6, window_bounds = array<i64: 1, 16, 128>}]} {
    %c0 = arith.constant 0 : index
    %c0_0 = arith.constant 0 : index
    %0 = vector.load %arg1[%c0, %c0_0] : memref<4x128xf32, #tpu.memory_space<vmem>>, vector<4x128xf32>
    %c0_1 = arith.constant 0 : index
    %c0_2 = arith.constant 0 : index
    %c0_3 = arith.constant 0 : index
    %1 = vector.load %arg2[%c0_1, %c0_2, %c0_3] : memref<6x1x128xf32, #tpu.memory_space<vmem>>, vector<6x1x128xf32>
    %c0_4 = arith.constant 0 : index
    %c0_5 = arith.constant 0 : index
    %c0_6 = arith.constant 0 : index
    %2 = vector.load %arg6[%c0_4, %c0_5, %c0_6] : memref<6x16x128xf32, #tpu.memory_space<vmem>>, vector<6x1x128xf32>
    tpu.vector_store %arg6[%c0_4, %c0_5, %c0_6], %1 {strides = array<i32>} : memref<6x16x128xf32, #tpu.memory_space<vmem>>, vector<6x1x128xf32>,
    %3 = vector.shape_cast %0 : vector<4x128xf32> to vector<1x4x128xf32>
    %4 = vector.shape_cast %3 : vector<1x4x128xf32> to vector<1x4x128xf32>
    %5 = vector.broadcast %4 : vector<1x4x128xf32> to vector<6x4x128xf32>
    %c0_7 = arith.constant 0 : index
    %c1 = arith.constant 1 : index
    %c0_8 = arith.constant 0 : index
    %6 = vector.load %arg6[%c0_7, %c1, %c0_8] : memref<6x16x128xf32, #tpu.memory_space<vmem>>, vector<6x4x128xf32>
    tpu.vector_store %arg6[%c0_7, %c1, %c0_8], %5 {strides = array<i32>} : memref<6x16x128xf32, #tpu.memory_space<vmem>>, vector<6x4x128xf32>,
    %c0_9 = arith.constant 0 : index
    %c0_10 = arith.constant 0 : index
    %c0_11 = arith.constant 0 : index
    %7 = vector.load %arg4[%c0_9, %c0_10, %c0_11] : memref<6x11x128xf32, #tpu.memory_space<vmem>>, vector<6x11x128xf32>
    %c0_12 = arith.constant 0 : index
    %c5 = arith.constant 5 : index
    %c0_13 = arith.constant 0 : index
    %8 = vector.load %arg6[%c0_12, %c5, %c0_13] : memref<6x16x128xf32, #tpu.memory_space<vmem>>, vector<6x11x128xf32>
    tpu.vector_store %arg6[%c0_12, %c5, %c0_13], %7 {strides = array<i32>} : memref<6x16x128xf32, #tpu.memory_space<vmem>>, vector<6x11x128xf32>,
    %c0_14 = arith.constant 0 : index
    %c0_15 = arith.constant 0 : index
    %c0_16 = arith.constant 0 : index
    %9 = vector.load %arg3[%c0_14, %c0_15, %c0_16] : memref<1x1x128xf32, #tpu.memory_space<vmem>>, vector<1x1x128xf32>
    %c0_17 = arith.constant 0 : index
    %c0_18 = arith.constant 0 : index
    %c0_19 = arith.constant 0 : index
    %10 = vector.load %arg7[%c0_17, %c0_18, %c0_19] : memref<1x16x128xf32, #tpu.memory_space<vmem>>, vector<1x1x128xf32>
    tpu.vector_store %arg7[%c0_17, %c0_18, %c0_19], %9 {strides = array<i32>} : memref<1x16x128xf32, #tpu.memory_space<vmem>>, vector<1x1x128xf32>,
    %11 = vector.shape_cast %0 : vector<4x128xf32> to vector<1x4x128xf32>
    %c0_20 = arith.constant 0 : index
    %c1_21 = arith.constant 1 : index
    %c0_22 = arith.constant 0 : index
    %12 = vector.load %arg7[%c0_20, %c1_21, %c0_22] : memref<1x16x128xf32, #tpu.memory_space<vmem>>, vector<1x4x128xf32>
    tpu.vector_store %arg7[%c0_20, %c1_21, %c0_22], %11 {strides = array<i32>} : memref<1x16x128xf32, #tpu.memory_space<vmem>>, vector<1x4x128xf32>,
    %c0_23 = arith.constant 0 : index
    %c0_24 = arith.constant 0 : index
    %c0_25 = arith.constant 0 : index
    %13 = vector.load %arg5[%c0_23, %c0_24, %c0_25] : memref<1x11x128xf32, #tpu.memory_space<vmem>>, vector<1x11x128xf32>
    %c0_26 = arith.constant 0 : index
    %c5_27 = arith.constant 5 : index
    %c0_28 = arith.constant 0 : index
    %14 = vector.load %arg7[%c0_26, %c5_27, %c0_28] : memref<1x16x128xf32, #tpu.memory_space<vmem>>, vector<1x11x128xf32>
    tpu.vector_store %arg7[%c0_26, %c5_27, %c0_28], %13 {strides = array<i32>} : memref<1x16x128xf32, #tpu.memory_space<vmem>>, vector<1x11x128xf32>,
    return
  }
  func.func @transform_0(%arg0: i32) -> (i32, i32) {
    %c0_i32 = arith.constant 0 : i32
    %c0_i32_0 = arith.constant 0 : i32
    %c0_i32_1 = arith.constant 0 : i32
    return %c0_i32, %c0_i32_0 : i32, i32
  }
  func.func @transform_1(%arg0: i32) -> (i32, i32, i32) {
    %c0_i32 = arith.constant 0 : i32
    %c0_i32_0 = arith.constant 0 : i32
    %c0_i32_1 = arith.constant 0 : i32
    %c0_i32_2 = arith.constant 0 : i32
    return %c0_i32, %c0_i32_0, %c0_i32_1 : i32, i32, i32
  }
  func.func @transform_2(%arg0: i32) -> (i32, i32, i32) {
    %c0_i32 = arith.constant 0 : i32
    %c0_i32_0 = arith.constant 0 : i32
    %c0_i32_1 = arith.constant 0 : i32
    %c0_i32_2 = arith.constant 0 : i32
    return %c0_i32, %c0_i32_0, %c0_i32_1 : i32, i32, i32
  }
  func.func @transform_3(%arg0: i32) -> (i32, i32, i32) {
    %c0_i32 = arith.constant 0 : i32
    %c0_i32_0 = arith.constant 0 : i32
    %c0_i32_1 = arith.constant 0 : i32
    %c0_i32_2 = arith.constant 0 : i32
    return %c0_i32, %c0_i32_0, %c0_i32_1 : i32, i32, i32
  }
  func.func @transform_4(%arg0: i32) -> (i32, i32, i32) {
    %c0_i32 = arith.constant 0 : i32
    %c0_i32_0 = arith.constant 0 : i32
    %c0_i32_1 = arith.constant 0 : i32
    %c0_i32_2 = arith.constant 0 : i32
    return %c0_i32, %c0_i32_0, %c0_i32_1 : i32, i32, i32
  }
  func.func @transform_5(%arg0: i32) -> (i32, i32, i32) {
    %c0_i32 = arith.constant 0 : i32
    %c0_i32_0 = arith.constant 0 : i32
    %c0_i32_1 = arith.constant 0 : i32
    %c0_i32_2 = arith.constant 0 : i32
    return %c0_i32, %c0_i32_0, %c0_i32_1 : i32, i32, i32
  }
  func.func @transform_6(%arg0: i32) -> (i32, i32, i32) {
    %c0_i32 = arith.constant 0 : i32
    %c0_i32_0 = arith.constant 0 : i32
    %c0_i32_1 = arith.constant 0 : i32
    %c0_i32_2 = arith.constant 0 : i32
    return %c0_i32, %c0_i32_0, %c0_i32_1 : i32, i32, i32
  }
}

</mosaic_0001>

<bundles_post_ra>
// kernel: tpu_custom_call.1
= control target key start
LH: loop header
LB: loop body
LE: loop exit
PB: predicated region body
PF: predicated region fallthrough
CT: control target
= control target key end

     0   :  { %12 = vsyncpa [#allocation3], 0  ;;  %s158_s19 = smov [#allocation2]   ;;  %s301_s0 = inlined_call_operand.vmem [shape: f32[4,128], index: 0, kind: input, shape index: {}]   ;;  %s302_s1 = inlined_call_operand.vmem [shape: f32[6,1,128], index: 1, kind: input, shape index: {}]   ;;  %s303_s2 = inlined_call_operand.vmem [shape: f32[1,1,128], index: 2, kind: input, shape index: {}]   ;;  %s304_s3 = inlined_call_operand.vmem [shape: f32[6,11,128], index: 3, kind: input, shape index: {}]   ;;  %s305_s4 = inlined_call_operand.vmem [shape: f32[1,11,128], index: 4, kind: input, shape index: {}]   ;;  %s306_s5 = inlined_call_operand.hbm [shape: f32[6,16,128], index: 5, kind: output, shape index: {0}]   ;;  %s307_s6 = inlined_call_operand.hbm [shape: f32[1,16,128], index: 6, kind: output, shape index: {1}]  }
   0x1   :  { %v25_v0 = vld [vmem:[%s302_s1] sm:$0x1]  ;;  %v26_v1 = vld [vmem:[%s302_s1 + $0x1] sm:$0x1]  ;;  %v27_v2 = vld [vmem:[%s302_s1 + $0x2] sm:$0x1] }
   0x2   :  { %31 = vst [vmem:[#allocation2] sm:$0x1] %v25_v0  ;;  %32 = vst [vmem:[#allocation2 + $0x10] sm:$0x1] %v26_v1  ;;  %v28_v3 = vld [vmem:[%s302_s1 + $0x3] sm:$0x1] }
   0x3   :  { %33 = vst [vmem:[#allocation2 + $0x20] sm:$0x1] %v27_v2  ;;  %v29_v4 = vld [vmem:[%s302_s1 + $0x4] sm:$0x1]  ;;  %v30_v5 = vld [vmem:[%s302_s1 + $0x5] sm:$0x1] }
   0x4   :  { %34 = vst [vmem:[#allocation2 + $0x30] sm:$0x1] %v28_v3  ;;  %35 = vst [vmem:[#allocation2 + $0x40] sm:$0x1] %v29_v4  ;;  %v24_v6 = vld [vmem:[%s301_s0] sm:$0xf] }
   0x5   :  { %36 = vst [vmem:[#allocation2 + $0x50] sm:$0x1] %v30_v5  ;;  %v43_v7 = vld [vmem:[%s304_s3] sm:$0xff]  ;;  %v44_v8 = vld [vmem:[%s304_s3 + $0x8] sm:$0x7]  ;;  %v45_v9 = vld [vmem:[%s304_s3 + $0x10] sm:$0xff] }
   0x6   :  { %37 = vst [vmem:[#allocation2 + $0x1] sm:$0xf] %v24_v6  ;;  %38 = vst [vmem:[#allocation2 + $0x11] sm:$0xf] %v24_v6  ;;  %v46_v10 = vld [vmem:[%s304_s3 + $0x18] sm:$0x7] }
   0x7   :  { %39 = vst [vmem:[#allocation2 + $0x21] sm:$0xf] %v24_v6  ;;  %40 = vst [vmem:[#allocation2 + $0x31] sm:$0xf] %v24_v6  ;;  %v47_v11 = vld [vmem:[%s304_s3 + $0x20] sm:$0xff]  ;;  %s79_s20 = sshll.u32 %s158_s19, 4  ;;  %s242_s20 = int_to_ptr.vmem [resolvable:$true] %s79_s20 }
   0x8   :  { %41 = vst [vmem:[#allocation2 + $0x41] sm:$0xf] %v24_v6  ;;  %42 = vst [vmem:[#allocation2 + $0x51] sm:$0xf] %v24_v6  ;;  %v48_v12 = vld [vmem:[%s304_s3 + $0x28] sm:$0x7] }
   0x9   :  { %69 = vst [vmem:[#allocation4 + $0x1] sm:$0xf] %v24_v6  ;;  %55 = vst [vmem:[#allocation2 + $0x5] sm:$0xff] %v43_v7  ;;  %v49_v13 = vld [vmem:[%s304_s3 + $0x30] sm:$0xff]  ;;  %v50_v14 = vld [vmem:[%s304_s3 + $0x38] sm:$0x7] }
   0xa   :  { %56 = vst [vmem:[#allocation2 + $0xd] sm:$0x7] %v44_v8  ;;  %57 = vst [vmem:[#allocation2 + $0x15] sm:$0xff] %v45_v9  ;;  %v51_v15 = vld [vmem:[%s304_s3 + $0x40] sm:$0xff]  ;;  %v52_v16 = vld [vmem:[%s304_s3 + $0x48] sm:$0x7] }
   0xb   :  { %58 = vst [vmem:[#allocation2 + $0x1d] sm:$0x7] %v46_v10  ;;  %59 = vst [vmem:[#allocation2 + $0x25] sm:$0xff] %v47_v11  ;;  %v53_v17 = vld [vmem:[%s304_s3 + $0x50] sm:$0xff]  ;;  %v54_v18 = vld [vmem:[%s304_s3 + $0x58] sm:$0x7] }
   0xc   :  { %60 = vst [vmem:[#allocation2 + $0x2d] sm:$0x7] %v48_v12  ;;  %61 = vst [vmem:[#allocation2 + $0x35] sm:$0xff] %v49_v13  ;;  %v67_v19 = vld [vmem:[%s303_s2] sm:$0x1]  ;;  %s159_s1 = smov [#allocation4]  }
   0xd   :  { %62 = vst [vmem:[#allocation2 + $0x3d] sm:$0x7] %v50_v14  ;;  %63 = vst [vmem:[#allocation2 + $0x45] sm:$0xff] %v51_v15  ;;  %v70_v20 = vld [vmem:[%s305_s4] sm:$0xff]  ;;  %s91_s15 = sshll.u32 %s159_s1, 4  ;;  %s265_s15 = int_to_ptr.vmem [resolvable:$true] %s91_s15 }
   0xe   :  { %64 = vst [vmem:[#allocation2 + $0x4d] sm:$0x7] %v52_v16  ;;  %65 = vst [vmem:[#allocation2 + $0x55] sm:$0xff] %v53_v17  ;;  %v71_v21 = vld [vmem:[%s305_s4 + $0x8] sm:$0x7] }
   0xf   :  { %66 = vst [vmem:[#allocation2 + $0x5d] sm:$0x7] %v54_v18  ;;  %68 = vst [vmem:[#allocation4] sm:$0x1] %v67_v19 }
  0x10   :  { %72 = vst [vmem:[#allocation4 + $0x5] sm:$0xff] %v70_v20 }
  0x11   :  { %13 = vsyncpa [#allocation5], 0  ;;  %73 = vst [vmem:[#allocation4 + $0xd] sm:$0x7] %v71_v21  ;;  %s110_s2 = scalar_lea.vmem %s242_s20, 1536  ;;  %p115_p1 = scmp.lt.s32.totalorder %s242_s20, %s242_s20 }
  0x12   :  { %p111_p0 = scmp.ne.s32.totalorder %s242_s20, %s110_s2  ;;  %p116_p2 = scmp.lt.s32.totalorder %s110_s2, %s110_s2 }
  0x14   :  { %p117_p3 = por %p116_p2, %p115_p1 }
  0x16   :  { %p118_p4 = pnand %p117_p3, %p111_p0 }
  0x18   :  { %121 = shalt.err (!%p118_p4)
}
  0x19   :  { %s122_s18 = scalar_lea.hbm %s306_s5, 1536 }
  0x1a   :  { %p123_p5 = scmp.ne.s32.totalorder %s306_s5, %s122_s18  ;;  %p126_p6 = scmp.lt.u32.totalorder %s122_s18, %s306_s5 }
  0x1c   :  { %p128_p7 = pnand %p126_p6, %p123_p5 }
  0x1e   :  { %131 = shalt.err (!%p128_p7)
}
  0x1f   :  { %s160_s23 = smov 128   ;;  %s161_s24 = smov 8  }
  0x20   :  { %85 = dma.vmem_to_hbm [thread:$0]  %s242_s20, 1536, %s306_s5, [#allocation3], %s160_s23, %s160_s23, %s161_s24  }
  0x21   :  { %s132_s27 = scalar_lea.vmem %s265_s15, 256  ;;  %p137_p9 = scmp.lt.s32.totalorder %s265_s15, %s265_s15 }
  0x22   :  { %p133_p8 = scmp.ne.s32.totalorder %s265_s15, %s132_s27  ;;  %p138_p10 = scmp.lt.s32.totalorder %s132_s27, %s132_s27 }
  0x24   :  { %p139_p11 = por %p138_p10, %p137_p9 }
  0x26   :  { %p140_p12 = pnand %p139_p11, %p133_p8 }
  0x28   :  { %143 = shalt.err (!%p140_p12)
}
  0x29   :  { %s144_s30 = scalar_lea.hbm %s307_s6, 256 }
  0x2a   :  { %p145_p13 = scmp.ne.s32.totalorder %s307_s6, %s144_s30  ;;  %p148_p0 = scmp.lt.u32.totalorder %s144_s30, %s307_s6 }
  0x2c   :  { %p150_p1 = pnand %p148_p0, %p145_p13 }
  0x2e   :  { %153 = shalt.err (!%p150_p1)
}
  0x2f   :  { %97 = dma.vmem_to_hbm [thread:$0]  %s265_s15, 256, %s307_s6, [#allocation5], %s160_s23, %s160_s23, %s161_s24  }
  0x30   :  { %154 = dma.done.wait [#allocation3], 1536  }
  0x31   :  { %155 = vsyncadd [#allocation3], 4294965760 }
  0x32   :  { %156 = dma.done.wait [#allocation5], 256  }
  0x33   :  { %157 = vsyncadd [#allocation5], 4294967040 }
  0x34   :  { %104 = vsyncpa [#allocation3], 1 }
  0x35   :  { %105 = vsyncpa [#allocation5], 1 }

</bundles_post_ra>
